<compile_context>
chip_gen: v7x
topology: tpu7x:2x2x1
jax: 0.10.0
libtpu: 0.0.40
codegen_flags: <defaults>
</compile_context>

<pallas_src>
import jax
import jax.numpy as jnp
from jax.experimental import pallas as pl
from jax.experimental.pallas import tpu as pltpu


def _round_up(n: int, m: int) -> int:
    return ((n + m - 1) // m) * m


def actor_critic_kernel(x_ref, wfe_ref, bfe_ref, wh_ref, bh_ref, out_ref):
    # Feature extractor: Linear + ReLU.
    # bf16 operands -> MXU, f32 accumulation; bias + ReLU in f32 on the VPU.
    x = x_ref[...].astype(jnp.bfloat16)
    feat = jnp.dot(x, wfe_ref[...], preferred_element_type=jnp.float32)
    feat = jnp.maximum(feat + bfe_ref[...], 0.0)

    # Fused actor+critic head: single lane-dense (HID_pad x 128) matmul.
    heads = jnp.dot(feat.astype(jnp.bfloat16), wh_ref[...],
                    preferred_element_type=jnp.float32)
    # Single bf16 store of the full 128-wide slab (halves the dominant HBM
    # write stream vs f32); accumulation above stayed in f32.
    out_ref[...] = (heads + bh_ref[...]).astype(out_ref.dtype)


def fuse_params(params):
    """Fold per-layer f32 params into the padded, fused kernel layout."""
    obs, hid = params["wfe"].shape
    n_actions = params["wa"].shape[1]
    hid_p = _round_up(hid, 128)
    nh_p = _round_up(n_actions + 1, 128)   # actor logits + 1 critic column

    wfe = jnp.zeros((obs, hid_p), jnp.float32).at[:, :hid].set(params["wfe"])
    bfe = jnp.zeros((1, hid_p), jnp.float32).at[:, :hid].set(params["bfe"])

    wh = jnp.zeros((hid_p, nh_p), jnp.float32)
    wh = wh.at[:hid, :n_actions].set(params["wa"])
    wh = wh.at[:hid, n_actions:n_actions + 1].set(params["wc"])
    bh = jnp.zeros((1, nh_p), jnp.float32)
    bh = bh.at[:, :n_actions].set(params["ba"])
    bh = bh.at[:, n_actions:n_actions + 1].set(params["bc"])

    return {
        "wfe": wfe.astype(jnp.bfloat16),   # bf16 MXU operands
        "bfe": bfe,                        # biases kept f32 (VPU path)
        "wh": wh.astype(jnp.bfloat16),
        "bh": bh,
        "n_actions": n_actions,
    }


def actor_critic_forward(x, fused, *, batch_tile_cap=2048):
    B, obs = x.shape
    n_actions = fused["n_actions"]
    hid_p = fused["wfe"].shape[1]
    nh_p = fused["wh"].shape[1]

    # Batch tile: multiple of 8, capped at 2048 (step-overhead amortization).
    # For batches with >= 2 row-tiles of work, split into at least 2 grid
    # steps so the "parallel" batch axis actually uses both v7x TensorCores.
    b8 = _round_up(B, 8)
    if b8 >= 16:
        tb = min(batch_tile_cap, _round_up(-(-b8 // 2), 8))
    else:
        tb = b8
    b_pad = _round_up(B, tb)
    if b_pad != B:
        x = jnp.pad(x, ((0, b_pad - B), (0, 0)))

    flops = 2 * b_pad * (obs * hid_p + hid_p * nh_p)
    weight_bytes = sum(int(fused[k].size) * fused[k].dtype.itemsize
                       for k in ("wfe", "bfe", "wh", "bh"))
    bytes_accessed = (
        b_pad * obs * 4          # x read (f32)
        + weight_bytes           # resident weights
        + b_pad * nh_p * 2       # fused bf16 output slab
    )

    # Explicit scoped-VMEM limit derived from the actual buffer footprint so
    # v5e (16 MiB default) can take the same tile sizes as v6e/v7x.
    vmem_footprint = (
        2 * tb * obs * 4         # x, double-buffered
        + 2 * tb * nh_p * 2      # bf16 output, double-buffered
        + tb * hid_p * 4         # feat intermediate (f32)
        + weight_bytes           # single-buffered resident weights
    )
    vmem_limit = int(min(64 << 20, max(32 << 20, 4 * vmem_footprint)))

    def _resident(shape):
        # Constant-index blocks: no double buffer needed.
        return pl.BlockSpec(shape, lambda i: (0, 0),
                            pipeline_mode=pl.Buffered(1))

    out = pl.pallas_call(
        actor_critic_kernel,
        out_shape=jax.ShapeDtypeStruct((b_pad, nh_p), jnp.bfloat16),
        grid=(b_pad // tb,),
        in_specs=[
            pl.BlockSpec((tb, obs), lambda i: (i, 0)),   # x: tiled over batch
            _resident(fused["wfe"].shape),               # weights VMEM-resident
            _resident(fused["bfe"].shape),
            _resident(fused["wh"].shape),
            _resident(fused["bh"].shape),
        ],
        out_specs=pl.BlockSpec((tb, nh_p), lambda i: (i, 0)),   # lane-dense slab
        compiler_params=pltpu.CompilerParams(
            dimension_semantics=("parallel",),           # megacore on v7x
            vmem_limit_bytes=vmem_limit),
        cost_estimate=pl.CostEstimate(flops=flops, transcendentals=0,
                                      bytes_accessed=bytes_accessed),
    )(x, fused["wfe"], fused["bfe"], fused["wh"], fused["bh"])

    # Slice the useful columns and restore f32 dtype (tiny B x (n_actions+1)
    # region; keeps the critic value / logits in the module's native dtype).
    action_logits = out[:B, :n_actions].astype(jnp.float32)
    critic_values = out[:B, n_actions:n_actions + 1].astype(jnp.float32)
    return action_logits, critic_values


def init_params(key, obs_dim, hidden_dim, n_actions):
    k = jax.random.split(key, 6)
    scale_fe = 1.0 / jnp.sqrt(obs_dim)
    scale_h = 1.0 / jnp.sqrt(hidden_dim)
    return {
        "wfe": jax.random.normal(k[0], (obs_dim, hidden_dim), jnp.float32) * scale_fe,
        "bfe": jax.random.normal(k[1], (1, hidden_dim), jnp.float32) * 0.01,
        "wa":  jax.random.normal(k[2], (hidden_dim, n_actions), jnp.float32) * scale_h,
        "ba":  jax.random.normal(k[3], (1, n_actions), jnp.float32) * 0.01,
        "wc":  jax.random.normal(k[4], (hidden_dim, 1), jnp.float32) * scale_h,
        "bc":  jax.random.normal(k[5], (1, 1), jnp.float32) * 0.01,
    }


def reference_forward(x, p):
    feat = jnp.maximum(x @ p["wfe"] + p["bfe"], 0.0)
    return feat @ p["wa"] + p["ba"], feat @ p["wc"] + p["bc"]


if __name__ == "__main__":
    key = jax.random.PRNGKey(0)
    kx, kp = jax.random.split(key)

    B, OBS, HID, NACT = 8, 32, 64, 16
    x = jax.random.normal(kx, (B, OBS), jnp.float32)
    params = init_params(kp, OBS, HID, NACT)
    fused = fuse_params(params)

    logits, values = actor_critic_forward(x, fused)
    jax.block_until_ready((logits, values))

    ref_logits, ref_values = reference_forward(x, params)
    assert logits.shape == (B, NACT) and values.shape == (B, 1)
    # bf16 MXU operands + bf16 output slab with f32 accumulation ->
    # loosened tolerances vs the pure-f32 reference.
    assert jnp.allclose(logits, ref_logits, atol=5e-2, rtol=5e-2)
    assert jnp.allclose(values, ref_values, atol=5e-2, rtol=5e-2)

    # TODO(synk): sample_action's torch.multinomial sampling and the PPO loss()
    # / Categorical-distribution / state_vae paths are training utilities
    # outside forward(); not kernelized here.
    print("KERNEL_OK")
</pallas_src>

<mosaic_0001>
module attributes {stable_mosaic.version = 11 : i64} {
  func.func @actor_critic_kernel(%arg0: i32, %arg1: memref<8x32xf32, #tpu.memory_space<vmem>>, %arg2: memref<32x128xbf16, #tpu.memory_space<vmem>>, %arg3: memref<1x128xf32, #tpu.memory_space<vmem>>, %arg4: memref<128x128xbf16, #tpu.memory_space<vmem>>, %arg5: memref<1x128xf32, #tpu.memory_space<vmem>>, %arg6: memref<8x128xbf16, #tpu.memory_space<vmem>>) attributes {dimension_semantics = [#tpu.dimension_semantics<parallel>], iteration_bounds = array<i64: 1>, scalar_prefetch = 0 : i64, scratch_operands = 0 : i64, tpu.core_type = #tpu.core_type<tc>, window_params = [{transform_indices = @transform_0, window_bounds = array<i64: 8, 32>}, {pipeline_mode = #tpu.pipeline_mode<synchronous>, transform_indices = @transform_1, window_bounds = array<i64: 32, 128>}, {pipeline_mode = #tpu.pipeline_mode<synchronous>, transform_indices = @transform_2, window_bounds = array<i64: 1, 128>}, {pipeline_mode = #tpu.pipeline_mode<synchronous>, transform_indices = @transform_3, window_bounds = array<i64: 128, 128>}, {pipeline_mode = #tpu.pipeline_mode<synchronous>, transform_indices = @transform_4, window_bounds = array<i64: 1, 128>}, {transform_indices = @transform_5, window_bounds = array<i64: 8, 128>}]} {
    %c0 = arith.constant 0 : index
    %c0_0 = arith.constant 0 : index
    %0 = vector.load %arg1[%c0, %c0_0] : memref<8x32xf32, #tpu.memory_space<vmem>>, vector<8x32xf32>
    %1 = arith.truncf %0 : vector<8x32xf32> to vector<8x32xbf16>
    %c0_1 = arith.constant 0 : index
    %c0_2 = arith.constant 0 : index
    %2 = vector.load %arg2[%c0_1, %c0_2] : memref<32x128xbf16, #tpu.memory_space<vmem>>, vector<32x128xbf16>
    %cst = arith.constant dense<0.000000e+00> : vector<8x128xf32>
    %3 = tpu.matmul %1, %2, %cst {dimension_numbers = #tpu.dot_dimension_numbers<[1], [0], [0], [1], [0, 0, 1, 1], [], []>} : vector<8x32xbf16>, vector<32x128xbf16>, vector<8x128xf32> -> vector<8x128xf32>
    %c0_3 = arith.constant 0 : index
    %c0_4 = arith.constant 0 : index
    %4 = vector.load %arg3[%c0_3, %c0_4] : memref<1x128xf32, #tpu.memory_space<vmem>>, vector<1x128xf32>
    %5 = vector.broadcast %4 : vector<1x128xf32> to vector<8x128xf32>
    %6 = arith.addf %3, %5 : vector<8x128xf32>
    %cst_5 = arith.constant 0.000000e+00 : f32
    %7 = vector.broadcast %cst_5 : f32 to vector<8x128xf32>
    %8 = arith.maximumf %6, %7 : vector<8x128xf32>
    %9 = arith.truncf %8 : vector<8x128xf32> to vector<8x128xbf16>
    %c0_6 = arith.constant 0 : index
    %c0_7 = arith.constant 0 : index
    %10 = vector.load %arg4[%c0_6, %c0_7] : memref<128x128xbf16, #tpu.memory_space<vmem>>, vector<128x128xbf16>
    %cst_8 = arith.constant dense<0.000000e+00> : vector<8x128xf32>
    %11 = tpu.matmul %9, %10, %cst_8 {dimension_numbers = #tpu.dot_dimension_numbers<[1], [0], [0], [1], [0, 0, 1, 1], [], []>} : vector<8x128xbf16>, vector<128x128xbf16>, vector<8x128xf32> -> vector<8x128xf32>
    %c0_9 = arith.constant 0 : index
    %c0_10 = arith.constant 0 : index
    %12 = vector.load %arg5[%c0_9, %c0_10] : memref<1x128xf32, #tpu.memory_space<vmem>>, vector<1x128xf32>
    %13 = vector.broadcast %12 : vector<1x128xf32> to vector<8x128xf32>
    %14 = arith.addf %11, %13 : vector<8x128xf32>
    %15 = arith.truncf %14 : vector<8x128xf32> to vector<8x128xbf16>
    %c0_11 = arith.constant 0 : index
    %c0_12 = arith.constant 0 : index
    %16 = vector.load %arg6[%c0_11, %c0_12] : memref<8x128xbf16, #tpu.memory_space<vmem>>, vector<8x128xbf16>
    tpu.vector_store %arg6[%c0_11, %c0_12], %15 {strides = array<i32>} : memref<8x128xbf16, #tpu.memory_space<vmem>>, vector<8x128xbf16>,
    return
  }
  func.func @transform_0(%arg0: i32) -> (i32, i32) {
    %c0_i32 = arith.constant 0 : i32
    %c0_i32_0 = arith.constant 0 : i32
    return %arg0, %c0_i32 : i32, i32
  }
  func.func @transform_1(%arg0: i32) -> (i32, i32) {
    %c0_i32 = arith.constant 0 : i32
    %c0_i32_0 = arith.constant 0 : i32
    %c0_i32_1 = arith.constant 0 : i32
    return %c0_i32, %c0_i32_0 : i32, i32
  }
  func.func @transform_2(%arg0: i32) -> (i32, i32) {
    %c0_i32 = arith.constant 0 : i32
    %c0_i32_0 = arith.constant 0 : i32
    %c0_i32_1 = arith.constant 0 : i32
    return %c0_i32, %c0_i32_0 : i32, i32
  }
  func.func @transform_3(%arg0: i32) -> (i32, i32) {
    %c0_i32 = arith.constant 0 : i32
    %c0_i32_0 = arith.constant 0 : i32
    %c0_i32_1 = arith.constant 0 : i32
    return %c0_i32, %c0_i32_0 : i32, i32
  }
  func.func @transform_4(%arg0: i32) -> (i32, i32) {
    %c0_i32 = arith.constant 0 : i32
    %c0_i32_0 = arith.constant 0 : i32
    %c0_i32_1 = arith.constant 0 : i32
    return %c0_i32, %c0_i32_0 : i32, i32
  }
  func.func @transform_5(%arg0: i32) -> (i32, i32) {
    %c0_i32 = arith.constant 0 : i32
    %c0_i32_0 = arith.constant 0 : i32
    return %arg0, %c0_i32 : i32, i32
  }
}

</mosaic_0001>

<bundles_post_ra>
// kernel: tpu_custom_call.1
= control target key start
LH: loop header
LB: loop body
LE: loop exit
PB: predicated region body
PF: predicated region fallthrough
CT: control target
= control target key end

     0   :  { %10 = vsyncpa [#allocation3], 0  ;;  %s524_s0 = inlined_call_operand.hbm [shape: f32[8,32], index: 0, kind: input, shape index: {}]   ;;  %s525_s1 = inlined_call_operand.hbm [shape: bf16[32,128], index: 1, kind: input, shape index: {}]   ;;  %s526_s2 = inlined_call_operand.vmem [shape: f32[1,128], index: 2, kind: input, shape index: {}]   ;;  %s527_s3 = inlined_call_operand.hbm [shape: bf16[128,128], index: 3, kind: input, shape index: {}]   ;;  %s528_s4 = inlined_call_operand.vmem [shape: f32[1,128], index: 4, kind: input, shape index: {}]   ;;  %s529_s5 = inlined_call_operand.hbm [shape: bf16[8,128], index: 5, kind: output, shape index: {}]  }
   0x1   :  { %11 = vsyncpa [#allocation6], 0 }
   0x2   :  { %12 = vsyncpa [#allocation4], 0  ;;  %s426_s18 = smov [#allocation5]   ;;  %s332_s22 = scalar_lea.hbm %s525_s1, 256 }
   0x3   :  { %s28_s19 = sshll.u32 %s426_s18, 4  ;;  %p333_p0 = scmp.ne.s32.totalorder %s525_s1, %s332_s22  ;;  %s29_s19 = int_to_ptr.vmem [resolvable:$true] %s28_s19 }
   0x4   :  { %p336_p1 = scmp.lt.u32.totalorder %s332_s22, %s525_s1 }
   0x6   :  { %p338_p2 = pnand %p336_p1, %p333_p0 }
   0x8   :  { %341 = shalt.err (!%p338_p2)
}
   0x9   :  { %s342_s27 = scalar_lea.vmem %s29_s19, 256  ;;  %p347_p4 = scmp.lt.s32.totalorder %s29_s19, %s29_s19 }
   0xa   :  { %p343_p3 = scmp.ne.s32.totalorder %s29_s19, %s342_s27  ;;  %p348_p5 = scmp.lt.s32.totalorder %s342_s27, %s342_s27 }
   0xc   :  { %p349_p6 = por %p348_p5, %p347_p4 }
   0xe   :  { %p350_p7 = pnand %p349_p6, %p343_p3 }
  0x10   :  { %353 = shalt.err (!%p350_p7)
}
  0x11   :  { %s427_s28 = smov 64   ;;  %s428_s29 = smov 4  }
  0x12   :  { %34 = dma.hbm_to_vmem [thread:$0]  %s525_s1, 256, %s29_s19, [#allocation6], %s427_s28, %s427_s28, %s428_s29  }
  0x13   :  { %s429_s7 = smov [#allocation2]   ;;  %s430_s9 = smov [#allocation7]  }
  0x14   :  { %s19_s8 = sshll.u32 %s429_s7, 4  ;;  %s42_s10 = sshll.u32 %s430_s9, 4  ;;  %s20_s8 = int_to_ptr.vmem [resolvable:$true] %s19_s8  ;;  %s43_s10 = int_to_ptr.vmem [resolvable:$true] %s42_s10 }
  0x15   :  { %s354_s13 = scalar_lea.hbm %s524_s0, 128 }
  0x16   :  { %p355_p8 = scmp.ne.s32.totalorder %s524_s0, %s354_s13  ;;  %p358_p9 = scmp.lt.u32.totalorder %s354_s13, %s524_s0 }
  0x18   :  { %p360_p10 = pnand %p358_p9, %p355_p8 }
  0x1a   :  { %363 = shalt.err (!%p360_p10)
}
  0x1b   :  { %s364_s1 = scalar_lea.vmem %s20_s8, 128  ;;  %p369_p12 = scmp.lt.s32.totalorder %s20_s8, %s20_s8 }
  0x1c   :  { %p365_p11 = scmp.ne.s32.totalorder %s20_s8, %s364_s1  ;;  %p370_p13 = scmp.lt.s32.totalorder %s364_s1, %s364_s1 }
  0x1e   :  { %p371_p0 = por %p370_p13, %p369_p12 }
  0x20   :  { %p372_p1 = pnand %p371_p0, %p365_p11 }
  0x22   :  { %375 = shalt.err (!%p372_p1)
}
  0x23   :  { %22 = dma.hbm_to_vmem [thread:$0]  %s524_s0, 128, %s20_s8, [#allocation3]  }
  0x24   :  { %s376_s22 = scalar_lea.hbm %s527_s3, 1024 }
  0x25   :  { %p377_p2 = scmp.ne.s32.totalorder %s527_s3, %s376_s22  ;;  %p380_p3 = scmp.lt.u32.totalorder %s376_s22, %s527_s3 }
  0x27   :  { %p382_p4 = pnand %p380_p3, %p377_p2 }
  0x29   :  { %385 = shalt.err (!%p382_p4)
}
  0x2a   :  { %s386_s27 = scalar_lea.vmem %s43_s10, 1024  ;;  %p391_p6 = scmp.lt.s32.totalorder %s43_s10, %s43_s10 }
  0x2b   :  { %p387_p5 = scmp.ne.s32.totalorder %s43_s10, %s386_s27  ;;  %p392_p7 = scmp.lt.s32.totalorder %s386_s27, %s386_s27 }
  0x2d   :  { %p393_p8 = por %p392_p7, %p391_p6 }
  0x2f   :  { %p394_p9 = pnand %p393_p8, %p387_p5 }
  0x31   :  { %397 = shalt.err (!%p394_p9)
}
  0x32   :  { %48 = dma.hbm_to_vmem [thread:$0]  %s527_s3, 1024, %s43_s10, [#allocation6], %s427_s28, %s427_s28, %s428_s29  }
  0x33   :  { %420 = dma.done.wait [#allocation3], 128  }
  0x34   :  { %421 = vsyncadd [#allocation3], 4294967168 }
  0x35   :  { %422 = dma.done.wait [#allocation6], 1280  }
  0x36   :  { %423 = vsyncadd [#allocation6], 4294966016  ;;  %v431_v0 = vmov 0.0   ;;  %vm432_vm0 = vmmov 0   ;;  %v322_v1 = vld [vmem:[#allocation5] sm:$0xff]   ;;  %v323_v2 = vld [vmem:[#allocation5 + $0x8] sm:$0xff]  }
  0x37   :  { %286 = vmatprep.subr.bf16.mxu0 %v431_v0  ;;  %290 = vmatprep.mubr.msk.bf16.mxu0 %vm432_vm0, %v431_v0  ;;  %v61_v3 = vld [vmem:[#allocation2] sm:$0xff]  ;;  %v324_v4 = vld [vmem:[#allocation7] sm:$0xff]   ;;  %vm86_vm1 = vcmask 261120   ;;  %v326_v7 = vld [vmem:[#allocation7 + $0x10] sm:$0xff]   ;;  %s433_s7 = smov [#allocation8]  }
  0x38   :  { %294 = vmatprep.subr.bf16.mxu1 %v431_v0  ;;  %310 = vmatprep.mubr.msk.bf16.mxu1 %vm432_vm0, %v431_v0  ;;  %v62_v5 = vpack.c.bf16 %v61_v3, %v61_v3  ;;  %v325_v6 = vld [vmem:[#allocation7 + $0x8] sm:$0xff]   ;;  %v327_v8 = vld [vmem:[#allocation7 + $0x18] sm:$0xff]   ;;  %v328_v9 = vld [vmem:[#allocation7 + $0x20] sm:$0xff]   ;;  %s251_s8 = sshll.u32 %s433_s7, 4  ;;  %s252_s8 = int_to_ptr.vmem [resolvable:$true] %s251_s8 }
  0x39   :  { %287 = vmatpush3.bf16.msra.mxu0 %v322_v1  ;;  %295 = vmatpush3.bf16.msra.mxu1 %v324_v4  ;;  %v329_v10 = vld [vmem:[#allocation7 + $0x28] sm:$0xff]   ;;  %v330_v11 = vld [vmem:[#allocation7 + $0x30] sm:$0xff]   ;;  %v331_v12 = vld [vmem:[#allocation7 + $0x38] sm:$0xff]   ;;  %p403_p11 = scmp.lt.s32.totalorder %s252_s8, %s252_s8 }
  0x3a   :  { %288 = vmatprep.subr.bf16.mxu0 %v431_v0  ;;  %296 = vmatprep.subr.bf16.mxu1 %v431_v0  ;;  %v261_v13 = vld [vmem:[%s526_s2] ss:$0 sm:$0xff]  ;;  %s398_s2 = scalar_lea.vmem %s252_s8, 64 }
  0x3b   :  { %v265_v21 = vld [vmem:[%s528_s4] ss:$0 sm:$0xff]  ;;  %p399_p10 = scmp.ne.s32.totalorder %s252_s8, %s398_s2  ;;  %p404_p12 = scmp.lt.s32.totalorder %s398_s2, %s398_s2 }
  0x3d   :  { %289 = vmatpush3.bf16.msra.mxu0 %v323_v2  ;;  %297 = vmatpush3.bf16.msra.mxu1 %v325_v6  ;;  %p405_p13 = por %p404_p12, %p403_p11 }
  0x3e   :  { %298 = vmatprep.subr.bf16.mxu1 %v431_v0 }
  0x3f   :  { %p406_p0 = pnand %p405_p13, %p399_p10 }
  0x40   :  { %291 = vmatmul.mubr.msk.bf16.vlgmr.msra.gmra.mrb[0].mxu0 %vm86_vm1, %v62_v5 }
  0x41   :  { %299 = vmatpush3.bf16.msra.mxu1 %v326_v7 }
  0x42   :  { %300 = vmatprep.subr.bf16.mxu1 %v431_v0 }
  0x45   :  { %301 = vmatpush3.bf16.msra.mxu1 %v327_v8 }
  0x46   :  { %302 = vmatprep.subr.bf16.mxu1 %v431_v0 }
  0x49   :  { %303 = vmatpush3.bf16.msra.mxu1 %v328_v9 }
  0x4a   :  { %304 = vmatprep.subr.bf16.mxu1 %v431_v0 }
  0x4d   :  { %305 = vmatpush3.bf16.msra.mxu1 %v329_v10 }
  0x4e   :  { %306 = vmatprep.subr.bf16.mxu1 %v431_v0 }
  0x51   :  { %307 = vmatpush3.bf16.msra.mxu1 %v330_v11 }
  0x52   :  { %308 = vmatprep.subr.bf16.mxu1 %v431_v0 }
  0x55   :  { %309 = vmatpush3.bf16.msra.mxu1 %v331_v12 }
 0x113   :  { %v124_v14 = vpop.f32.mrb[0].mxu0 }
 0x114   :  { %v125_v15 = vadd.f32 %v261_v13, %v124_v14  ;;  %v292_v16 = vpop.f32.mrb[1].mxu0 }
 0x115   :  { %v127_v17 = vpop.f32.mrb[2].mxu0 }
 0x116   :  { %v130_v18 = vmax.f32 %v125_v15, 0.0  ;;  %v293_v19 = vpop.f32.mrb[3].mxu0 }
 0x118   :  { %v131_v20 = vpack.c.bf16 %v130_v18, %v130_v18 }
 0x11a   :  { %311 = vmatmul.mubr.bf16.vlgmr.msra.gmra.mrb[0].mxu1 %v131_v20 }
 0x1ed   :  { %v237_v22 = vpop.f32.mrb[0].mxu1 }
 0x1ee   :  { %v238_v23 = vadd.f32 %v265_v21, %v237_v22  ;;  %v312_v24 = vpop.f32.mrb[1].mxu1 }
 0x1ef   :  { %v240_v25 = vpop.f32.mrb[2].mxu1 }
 0x1f0   :  { %v243_v26 = vpack.c.bf16 %v238_v23, %v238_v23  ;;  %v313_v27 = vpop.f32.mrb[3].mxu1 }
 0x1f2   :  { %244 = vst [vmem:[#allocation8] sm:$0xf] %v243_v26 }
 0x1f3   :  { %409 = shalt.err (!%p406_p0)
}
 0x1f4   :  { %s410_s4 = scalar_lea.hbm %s529_s5, 64 }
 0x1f5   :  { %p411_p1 = scmp.ne.s32.totalorder %s529_s5, %s410_s4  ;;  %p414_p2 = scmp.lt.u32.totalorder %s410_s4, %s529_s5 }
 0x1f7   :  { %p416_p3 = pnand %p414_p2, %p411_p1 }
 0x1f9   :  { %419 = shalt.err (!%p416_p3)
}
 0x1fa   :  { %254 = dma.vmem_to_hbm [thread:$0]  %s252_s8, 64, %s529_s5, [#allocation4]  }
 0x1fb   :  { %424 = dma.done.wait [#allocation4], 64  }
 0x1fc   :  { %425 = vsyncadd [#allocation4], 4294967232 }
 0x1fd   :  { %258 = vsyncpa [#allocation3], 1 }
 0x1fe   :  { %259 = vsyncpa [#allocation6], 1 }
 0x1ff   :  { %260 = vsyncpa [#allocation4], 1 }

</bundles_post_ra>
